<compile_context>
chip_gen: v7x
topology: tpu7x:2x2x1
jax: 0.10.0
libtpu: 0.0.40
codegen_flags: <defaults>
</compile_context>

<pallas_src>
import functools

import numpy as np
import jax
import jax.numpy as jnp
from jax import lax
from jax.experimental import pallas as pl
from jax.experimental.pallas import tpu as pltpu

NUM_SEGMENTS = 3  # SegmentEmbedding(3, embed_size, padding_idx=0)


# ---------------------------------------------------------------------------
# Path 1 (small / medium vocab): one-hot matmul gather on the MXU.
# ---------------------------------------------------------------------------
def _embed_matmul_kernel(tok_ids_ref,   # (T, 1) int32 token ids for this tile
                         seg_ids_ref,   # (T, 1) int32 segment ids for this tile
                         pos_ref,       # (S, E) f32 positional table, VMEM-resident
                         tab_ref,       # (Vp, E) bf16 [token rows | segment rows | 0-pad], resident
                         out_ref,       # (T, E) output tile
                         *, vocab_size, s_tiles):
    T, E = out_ref.shape
    Vp = tab_ref.shape[0]

    tok_ids = tok_ids_ref[...]                                   # (T, 1)
    seg_ids = seg_ids_ref[...]                                   # (T, 1)

    # Combined one-hot over [token rows | segment rows]; direct bool -> bf16 cast
    # (no f32 select pass).  Token columns (< V) and segment columns (V..V+2)
    # never collide, so one matmul yields token_emb + segment_emb.
    col_iota = lax.broadcasted_iota(jnp.int32, (T, Vp), 1)
    one_hot = ((col_iota == tok_ids) |
               (col_iota == (seg_ids + vocab_size))).astype(jnp.bfloat16)      # (T, Vp)

    # 1.0 * bf16 rows accumulated in f32 -> exact gather at bf16 table precision.
    emb = jnp.dot(one_hot, tab_ref[...], preferred_element_type=jnp.float32)   # (T, E)

    # Positional rows: tokens within a tile are contiguous positions (T | S), so a
    # single static-size slice of the resident table suffices (no per-tile DMA).
    base = pl.multiple_of((pl.program_id(0) % s_tiles) * T, T)
    out_ref[...] = (emb + pos_ref[pl.ds(base, T), :]).astype(out_ref.dtype)
    # TODO(synk): training-mode dropout (p=0.1) would need pltpu.prng_seed /
    # pltpu.prng_random_bits + keep-mask scaling; eval mode is the identity.


# ---------------------------------------------------------------------------
# Path 2 (large vocab): per-row gather from the resident table; ids live in SMEM
# (scalar prefetch).  Avoids the O(V) one-hot matmul that turns the kernel
# MXU-bound around V ~ 1k (v5e) - 2.5k (v6e).
# ---------------------------------------------------------------------------
def _embed_rowgather_kernel(tok_ids_sref,  # (N,) int32 in SMEM (scalar-prefetched)
                            seg_ids_sref,  # (N,) int32 in SMEM (scalar-prefetched)
                            pos_ref,       # (S, E) f32, resident
                            tab_ref,       # (Vp, E) bf16 [token | segment | pad], resident
                            out_ref,       # (T, E) output tile
                            *, vocab_size, s_tiles):
    T, E = out_ref.shape
    i = pl.program_id(0)
    tok_base = i * T
    pos_base = (i % s_tiles) * T

    def body(t, carry):
        tok_id = tok_ids_sref[tok_base + t]
        seg_id = seg_ids_sref[tok_base + t]
        row = (tab_ref[tok_id].astype(jnp.float32)
               + tab_ref[vocab_size + seg_id].astype(jnp.float32)
               + pos_ref[pos_base + t])
        out_ref[t] = row.astype(out_ref.dtype)
        return carry

    lax.fori_loop(0, T, body, 0)
    # TODO(synk): for tables too large for VMEM residency (e.g. 30522 x 768), switch to a
    # double-buffered HBM DMA row gather (memory_space=pl.ANY + pltpu.make_async_copy).


def _pick_seq_tile(seq_len, padded_rows, embed_size, cap=512,
                   tile_budget_bytes=24 * (1 << 20)):
    """Largest multiple-of-8 divisor of seq_len (<= cap) whose tile buffers fit the budget."""
    best = 8 if seq_len % 8 == 0 else seq_len
    for t in range(8, min(seq_len, cap) + 1, 8):
        if seq_len % t:
            continue
        # double-buffered f32 output tile + bf16 one-hot scratch
        if 2 * t * embed_size * 4 + t * padded_rows * 2 <= tile_budget_bytes:
            best = t
    return best


def bert_embedding(sequence, segment_label, token_table, pos_table, segment_table,
                   *, out_dtype=jnp.float32, matmul_gather_max_vocab=2048):
    """sequence, segment_label: (B, S) int.  Returns (B, S, E) in `out_dtype` (default f32)."""
    B, S = sequence.shape
    V, E = token_table.shape
    assert segment_table.shape == (NUM_SEGMENTS, E)
    assert pos_table.shape[0] >= S and pos_table.shape[1] == E
    assert E % 128 == 0, "embed_size should be lane-aligned (multiple of 128)"

    # Combined [token | segment | zero-pad] table in bf16; rows padded to a multiple of 128
    # (MXU-friendly contraction dim; padded rows are zero so they never contribute).
    Vp = max(128, ((V + NUM_SEGMENTS + 127) // 128) * 128)
    tab = jnp.zeros((Vp, E), jnp.bfloat16)
    tab = tab.at[:V].set(token_table.astype(jnp.bfloat16))
    tab = tab.at[V:V + NUM_SEGMENTS].set(segment_table.astype(jnp.bfloat16))

    # Resident positional table (fetched once).  Cast to bf16 here if S*E*4 is large.
    pos = pos_table[:S].astype(jnp.float32)

    N = B * S
    T = _pick_seq_tile(S, Vp, E)
    assert S % T == 0 and T % 8 == 0, "sequence length must tile by a multiple of 8"
    s_tiles = S // T
    n_tiles = N // T

    use_matmul = V <= matmul_gather_max_vocab

    # Explicit VMEM budget (v5e scoped default is only 16 MiB).
    out_itemsize = jnp.dtype(out_dtype).itemsize
    est = (Vp * E * 2                      # resident combined table (single-buffered)
           + S * E * 4                     # resident positional table (single-buffered)
           + 2 * T * E * out_itemsize      # double-buffered output tile
           + (T * Vp * 2 if use_matmul else 0)   # bf16 one-hot scratch
           + 4 * T * 4)                    # id tiles
    vmem_limit = int(min(64 * (1 << 20), max(16 * (1 << 20), est * 3 // 2 + (2 << 20))))

    compiler_params = pltpu.CompilerParams(
        # TODO(synk): on v7x, verify this grid axis is actually split across the two
        # TensorCores; if not, switch to pltpu.CORE_PARALLEL (or pl.core_map over
        # pltpu.create_tensorcore_mesh).  "parallel" is kept here as the portable default.
        dimension_semantics=("parallel",),
        vmem_limit_bytes=vmem_limit,
    )

    resident = pl.Buffered(1)   # constant index_map -> single buffer (halves resident VMEM)

    if use_matmul:
        tok_ids = sequence.reshape(N, 1).astype(jnp.int32)
        seg_ids = segment_label.reshape(N, 1).astype(jnp.int32)
        kernel = functools.partial(_embed_matmul_kernel, vocab_size=V, s_tiles=s_tiles)
        grid_spec = pltpu.PrefetchScalarGridSpec(
            num_scalar_prefetch=0,
            grid=(n_tiles,),
            in_specs=[
                pl.BlockSpec((T, 1), lambda i: (i, 0)),                            # token ids
                pl.BlockSpec((T, 1), lambda i: (i, 0)),                            # segment ids
                pl.BlockSpec((S, E), lambda i: (0, 0), pipeline_mode=resident),    # pos (resident)
                pl.BlockSpec((Vp, E), lambda i: (0, 0), pipeline_mode=resident),   # table (resident)
            ],
            out_specs=pl.BlockSpec((T, E), lambda i: (i, 0)),
        )
        out_flat = pl.pallas_call(
            kernel,
            grid_spec=grid_spec,
            out_shape=jax.ShapeDtypeStruct((N, E), out_dtype),
            compiler_params=compiler_params,
        )(tok_ids, seg_ids, pos, tab)
    else:
        tok_ids = sequence.reshape(N).astype(jnp.int32)
        seg_ids = segment_label.reshape(N).astype(jnp.int32)
        kernel = functools.partial(_embed_rowgather_kernel, vocab_size=V, s_tiles=s_tiles)
        grid_spec = pltpu.PrefetchScalarGridSpec(
            num_scalar_prefetch=2,          # token ids + segment ids land in SMEM
            grid=(n_tiles,),
            in_specs=[
                pl.BlockSpec((S, E), lambda i, *_: (0, 0), pipeline_mode=resident),   # pos
                pl.BlockSpec((Vp, E), lambda i, *_: (0, 0), pipeline_mode=resident),  # table
            ],
            out_specs=pl.BlockSpec((T, E), lambda i, *_: (i, 0)),
        )
        out_flat = pl.pallas_call(
            kernel,
            grid_spec=grid_spec,
            out_shape=jax.ShapeDtypeStruct((N, E), out_dtype),
            compiler_params=compiler_params,
        )(tok_ids, seg_ids, pos, tab)

    return out_flat.reshape(B, S, E)


def make_sinusoidal_pe(max_len, d_model):
    """Standard BERT sinusoidal positional encoding table, shape (max_len, d_model)."""
    position = np.arange(max_len, dtype=np.float32)[:, None]
    div_term = np.exp(np.arange(0, d_model, 2, dtype=np.float32)
                      * -(np.log(10000.0) / d_model))
    pe = np.zeros((max_len, d_model), dtype=np.float32)
    pe[:, 0::2] = np.sin(position * div_term)
    pe[:, 1::2] = np.cos(position * div_term)
    return jnp.asarray(pe)


if __name__ == "__main__":
    # Small synthetic config consistent with the module.
    vocab_size = 64
    embed_size = 128   # lane-aligned hidden size
    B, S = 2, 8

    key = jax.random.PRNGKey(0)
    k_tok, k_seg, k_ids, k_lbl = jax.random.split(key, 4)

    # Deterministic parameter init (nn.Embedding ~ N(0,1); padding_idx=0 row is zero).
    token_table = jax.random.normal(k_tok, (vocab_size, embed_size), dtype=jnp.float32)
    token_table = token_table.at[0].set(0.0)
    segment_table = jax.random.normal(k_seg, (NUM_SEGMENTS, embed_size), dtype=jnp.float32)
    segment_table = segment_table.at[0].set(0.0)
    pos_table = make_sinusoidal_pe(S, embed_size)  # fixed (non-learned) buffer

    sequence = jax.random.randint(k_ids, (B, S), 0, vocab_size, dtype=jnp.int32)
    segment_label = jax.random.randint(k_lbl, (B, S), 0, NUM_SEGMENTS, dtype=jnp.int32)

    out = bert_embedding(sequence, segment_label, token_table, pos_table, segment_table)
    out = jax.block_until_ready(out)

    # Pure-JAX reference (eval-mode dropout == identity).  The kernel stores the embedding
    # tables in bf16, so the reference uses the bf16-rounded tables; with that accounted
    # for (and matching summation order), the kernel result is exact.
    tok_b = token_table.astype(jnp.bfloat16).astype(jnp.float32)
    seg_b = segment_table.astype(jnp.bfloat16).astype(jnp.float32)
    ref = (jnp.take(tok_b, sequence, axis=0)
           + jnp.take(seg_b, segment_label, axis=0)
           + pos_table[None, :S, :])
    np.testing.assert_allclose(np.asarray(out), np.asarray(ref), rtol=1e-6, atol=1e-6)

    print("KERNEL_OK")
</pallas_src>

<mosaic_0001>
module attributes {stable_mosaic.version = 11 : i64} {
  func.func @_embed_matmul_kernel(%arg0: i32, %arg1: memref<8x1xi32, #tpu.memory_space<vmem>>, %arg2: memref<8x1xi32, #tpu.memory_space<vmem>>, %arg3: memref<8x128xf32, #tpu.memory_space<vmem>>, %arg4: memref<128x128xbf16, #tpu.memory_space<vmem>>, %arg5: memref<8x128xf32, #tpu.memory_space<vmem>>) attributes {dimension_semantics = [#tpu.dimension_semantics<parallel>], iteration_bounds = array<i64: 2>, scalar_prefetch = 0 : i64, scratch_operands = 0 : i64, tpu.core_type = #tpu.core_type<tc>, window_params = [{transform_indices = @transform_0, window_bounds = array<i64: 8, 1>}, {transform_indices = @transform_1, window_bounds = array<i64: 8, 1>}, {pipeline_mode = #tpu.pipeline_mode<synchronous>, transform_indices = @transform_2, window_bounds = array<i64: 8, 128>}, {pipeline_mode = #tpu.pipeline_mode<synchronous>, transform_indices = @transform_3, window_bounds = array<i64: 128, 128>}, {transform_indices = @transform_4, window_bounds = array<i64: 8, 128>}]} {
    %c0 = arith.constant 0 : index
    %c0_0 = arith.constant 0 : index
    %0 = vector.load %arg1[%c0, %c0_0] : memref<8x1xi32, #tpu.memory_space<vmem>>, vector<8x1xi32>
    %c0_1 = arith.constant 0 : index
    %c0_2 = arith.constant 0 : index
    %1 = vector.load %arg2[%c0_1, %c0_2] : memref<8x1xi32, #tpu.memory_space<vmem>>, vector<8x1xi32>
    %2 = tpu.iota {dimensions = array<i32: 1>} : vector<8x128xi32>
    %3 = vector.broadcast %0 : vector<8x1xi32> to vector<8x128xi32>
    %4 = arith.cmpi eq, %2, %3 : vector<8x128xi32>
    %c64_i32 = arith.constant 64 : i32
    %5 = vector.broadcast %c64_i32 : i32 to vector<8x1xi32>
    %6 = arith.addi %1, %5 : vector<8x1xi32>
    %7 = vector.broadcast %6 : vector<8x1xi32> to vector<8x128xi32>
    %8 = arith.cmpi eq, %2, %7 : vector<8x128xi32>
    %9 = arith.ori %4, %8 : vector<8x128xi1>
    %10 = arith.extui %9 : vector<8x128xi1> to vector<8x128xi32>
    %11 = arith.sitofp %10 : vector<8x128xi32> to vector<8x128xf32>
    %12 = arith.truncf %11 : vector<8x128xf32> to vector<8x128xbf16>
    %c0_3 = arith.constant 0 : index
    %c0_4 = arith.constant 0 : index
    %13 = vector.load %arg4[%c0_3, %c0_4] : memref<128x128xbf16, #tpu.memory_space<vmem>>, vector<128x128xbf16>
    %cst = arith.constant dense<0.000000e+00> : vector<8x128xf32>
    %14 = tpu.matmul %12, %13, %cst {dimension_numbers = #tpu.dot_dimension_numbers<[1], [0], [0], [1], [0, 0, 1, 1], [], []>} : vector<8x128xbf16>, vector<128x128xbf16>, vector<8x128xf32> -> vector<8x128xf32>
    %c1_i32 = arith.constant 1 : i32
    %c0_i32 = arith.constant 0 : i32
    %15 = arith.cmpi eq, %c1_i32, %c0_i32 : i32
    %c1_i32_5 = arith.constant 1 : i32
    %16 = arith.select %15, %c1_i32_5, %c1_i32 : i32
    %17 = arith.remsi %arg0, %16 : i32
    %c0_i32_6 = arith.constant 0 : i32
    %18 = arith.cmpi ne, %17, %c0_i32_6 : i32
    %c0_i32_7 = arith.constant 0 : i32
    %19 = arith.cmpi slt, %17, %c0_i32_7 : i32
    %c0_i32_8 = arith.constant 0 : i32
    %20 = arith.cmpi slt, %16, %c0_i32_8 : i32
    %21 = arith.xori %19, %20 : i1
    %22 = arith.andi %21, %18 : i1
    %23 = arith.addi %17, %16 : i32
    %24 = arith.select %22, %23, %17 : i32
    %c8_i32 = arith.constant 8 : i32
    %25 = arith.muli %24, %c8_i32 : i32
    %26 = tpu.assume_multiple %25, 8 : i32
    %27 = arith.index_cast %26 : i32 to index
    %c0_9 = arith.constant 0 : index
    %28 = vector.load %arg3[%27, %c0_9] : memref<8x128xf32, #tpu.memory_space<vmem>>, vector<8x128xf32>
    %29 = arith.addf %14, %28 : vector<8x128xf32>
    %c0_10 = arith.constant 0 : index
    %c0_11 = arith.constant 0 : index
    %30 = vector.load %arg5[%c0_10, %c0_11] : memref<8x128xf32, #tpu.memory_space<vmem>>, vector<8x128xf32>
    tpu.vector_store %arg5[%c0_10, %c0_11], %29 {strides = array<i32>} : memref<8x128xf32, #tpu.memory_space<vmem>>, vector<8x128xf32>,
    return
  }
  func.func @transform_0(%arg0: i32) -> (i32, i32) {
    %c0_i32 = arith.constant 0 : i32
    %c0_i32_0 = arith.constant 0 : i32
    return %arg0, %c0_i32 : i32, i32
  }
  func.func @transform_1(%arg0: i32) -> (i32, i32) {
    %c0_i32 = arith.constant 0 : i32
    %c0_i32_0 = arith.constant 0 : i32
    return %arg0, %c0_i32 : i32, i32
  }
  func.func @transform_2(%arg0: i32) -> (i32, i32) {
    %c0_i32 = arith.constant 0 : i32
    %c0_i32_0 = arith.constant 0 : i32
    %c0_i32_1 = arith.constant 0 : i32
    return %c0_i32, %c0_i32_0 : i32, i32
  }
  func.func @transform_3(%arg0: i32) -> (i32, i32) {
    %c0_i32 = arith.constant 0 : i32
    %c0_i32_0 = arith.constant 0 : i32
    %c0_i32_1 = arith.constant 0 : i32
    return %c0_i32, %c0_i32_0 : i32, i32
  }
  func.func @transform_4(%arg0: i32) -> (i32, i32) {
    %c0_i32 = arith.constant 0 : i32
    %c0_i32_0 = arith.constant 0 : i32
    return %arg0, %c0_i32 : i32, i32
  }
}

</mosaic_0001>

<bundles_post_ra>
// kernel: tpu_custom_call.1
= control target key start
LH: loop header
LB: loop body
LE: loop exit
PB: predicated region body
PF: predicated region fallthrough
CT: control target
= control target key end

     0   :  { %9 = vsyncpa [#allocation3], 0  ;;  %s834_s0 = inlined_call_operand.vmem [shape: s32[16,1], index: 0, kind: input, shape index: {}]   ;;  %s835_s1 = inlined_call_operand.vmem [shape: s32[16,1], index: 1, kind: input, shape index: {}]   ;;  %s836_s2 = inlined_call_operand.vmem [shape: f32[8,128], index: 2, kind: input, shape index: {}]   ;;  %s837_s3 = inlined_call_operand.hbm [shape: bf16[128,128], index: 3, kind: input, shape index: {}]   ;;  %s838_s4 = inlined_call_operand.hbm [shape: f32[16,128], index: 4, kind: output, shape index: {}]  }
   0x1   :  { %10 = vsyncpa [#allocation4], 0 }
   0x2   :  { %12 = vsyncpa [#allocation4 + $0x1], 0  ;;  %s693_s15 = smov 0   ;;  %s695_s16 = smov 0  }
   0x3   :  { %s697_s17 = smov 0   ;;  %s699_s18 = smov 0  }
   0x4 LB: > { %s714_s19 = sadd.s32 4294967295, %s658_s18   ;;  %s446_s20 = sadd.s32 4294967294, %s658_s18   ;;  %s658_s18 = sphi %s699_s18, %s854_s18   ;;  %s654_s17 = sphi %s697_s17, %s853_s17   ;;  %s650_s16 = sphi %s695_s16, %s852_s16   ;;  %s646_s15 = sphi %s693_s15, %s851_s15  }
   0x5   : > { %s718_s21 = sadd.s32 1, %s658_s18   ;;  %s119_s22 = sadd.s32 1, %s654_s17 }
   0x6   : > { %s116_s23 = ssub.s32 %s658_s18, %s718_s21  ;;  %p129_p0 = scmp.ne.s32.totalorder %s654_s17, %s650_s16 }
   0x7   : > { %p117_p1 = scmp.eq.s32.totalorder %s116_s23, 0  ;;  %p130_p2 = scmp.eq.s32.totalorder %s714_s19, 1 }
   0x8   : > { %p135_p3 = scmp.ne.s32.totalorder %s650_s16, %s646_s15  ;;  %p136_p4 = scmp.eq.s32.totalorder %s446_s20, 1 }
   0x9   : > { %s729_s24 = scalar_select %p117_p1, %s654_s17, %s119_s22  }
   0xa   : > { %p731_p5 = por %p130_p2, %p129_p0  ;;  %p735_p6 = por %p136_p4, %p135_p3 }
   0xb   : > { %p447_p7 = scmp.ge.s32.totalorder %s658_s18, 1  ;;  %p143_p8 = scmp.lt.s32.totalorder %s658_s18, 3 }
   0xc   : > { %s842_s25 = scalar_select %p731_p5, 1, 0 }
   0xd   : > { %s843_s26 = scalar_select %p735_p6, 1, 0 }
   0xe   : > { %p839_p9 = scmp.eq.s32.totalorder %s714_s19, 0  ;;  %p742_p10 = pnand %p447_p7, %p143_p8 }
   0xf   : > { %s660_s28 = smov [#allocation2]   ;;  %s564_s7 = scalar_lea.hbm %s837_s3, 1024 }
  0x10   : > { %s844_s27 = scalar_select %p742_p10, 1, 0 }
  0x11   : > { %s158_s29 = sshll.u32 %s660_s28, 4  ;;  %p505_p11 = pneg %p742_p10  ;;  %s159_s29 = int_to_ptr.vmem [resolvable:$true] %s158_s29 }
  0x12   : > { %p565_p13 = scmp.ne.s32.totalorder %s837_s3, %s564_s7  ;;  %p571_p3 = scmp.lt.u32.totalorder %s564_s7, %s837_s3 }
  0x13   : > { %p750_p12 = pnand %p839_p9, %p505_p11 }
  0x15   : > { %p566_p0 = pneg %p750_p12 }
  0x17   : > { %p567_p1 = pnand %p566_p0, %p565_p13 }
  0x19   : > { %p568_p2 = pneg %p567_p1 }
  0x1b   : > { %p573_p4 = pnand %p571_p3, %p568_p2 }
  0x1d   : > { %576 = shalt.err (!%p573_p4)
}
  0x1e   : > { %s577_s12 = scalar_lea.vmem %s159_s29, 1024  ;;  %p585_p9 = scmp.lt.s32.totalorder %s159_s29, %s159_s29 }
  0x1f   : > { %p578_p7 = scmp.ne.s32.totalorder %s159_s29, %s577_s12  ;;  %p586_p6 = scmp.lt.s32.totalorder %s577_s12, %s577_s12 }
  0x21   : > { %p580_p8 = pnand %p578_p7, %p566_p0  ;;  %p587_p5 = por %p586_p6, %p585_p9 }
  0x23   : > { %p581_p11 = pneg %p580_p8 }
  0x25   : > { %p588_p10 = pnand %p587_p5, %p581_p11 }
  0x27   : > { %591 = shalt.err (!%p588_p10)
}
  0x28   : > { %s661_s13 = smov 64   ;;  %s662_s14 = smov 4  }
  0x29   : > { %508 = dma.hbm_to_vmem [thread:$0]  (!%p750_p12), %s837_s3, 1024, %s159_s29, [#allocation3], %s661_s13, %s661_s13, %s662_s14  }
  0x2a   : > { %p846_p13 = scmp.ne.s32.totalorder %s844_s27, 0 }
  0x2b   : > { %p847_p1 = scmp.eq.s32.totalorder (!%p846_p13), %s714_s19, 0 }
  0x2c   : > { %188 = sbr.rel (%p846_p13) target bundleno = 422 (0x1a6), region = 36 }
  0x33   : > { %637 = dma.done.wait (%p847_p1), [#allocation3], 1024   ;;  %p848_p0 = pmov %p847_p1 }
  0x34   : > { %p217_p5 = scmp.lt.s32.totalorder %s714_s19, 1  ;;  %v663_v0 = vmov 0   ;;  %v664_v1 = vmov 0.0   ;;  %v556_v5 = vld [vmem:[#allocation2] sm:$0xff]   ;;  %v557_v6 = vld [vmem:[#allocation2 + $0x8] sm:$0xff]   ;;  %v558_v7 = vld [vmem:[#allocation2 + $0x10] sm:$0xff]   ;;  %v228_v13 = vlaneseq }
  0x35   : > { %639 = vsyncadd (%p848_p0), [#allocation3], 4294966272  ;;  %555 = vset.pattern.permute.xlu0 %v663_v0  ;;  %479 = vmatprep.subr.bf16.mxu0 %v664_v1  ;;  %vm665_vm0 = vmmov 0   ;;  %v559_v8 = vld [vmem:[#allocation2 + $0x18] sm:$0xff]   ;;  %v560_v9 = vld [vmem:[#allocation2 + $0x20] sm:$0xff]   ;;  %s214_s8 = sand.u32 1, %s650_s16  }
  0x36   : > { %s218_s23 = scalar_select %p217_p5, %s714_s19, 1  ;;  %480 = vmatpush3.bf16.msra.mxu0 %v556_v5  ;;  %495 = vmatprep.mubr.msk.bf16.mxu0 %vm665_vm0, %v664_v1  ;;  %v561_v10 = vld [vmem:[#allocation2 + $0x28] sm:$0xff]   ;;  %v562_v11 = vld [vmem:[#allocation2 + $0x30] sm:$0xff]   ;;  %v563_v12 = vld [vmem:[#allocation2 + $0x38] sm:$0xff]   ;;  %v229_v15 = vand.u32 127, %v228_v13 }
  0x37   : > { %481 = vmatprep.subr.bf16.mxu0 %v664_v1  ;;  %v666_v17 = vmov 1.0|1.0   ;;  %s452_s9 = sshll.u32 %s214_s8, 3  ;;  %v259_v18 = vld [vmem:[%s836_s2] sm:$0xff]  ;;  %s467_s12 = sshll.u32 %s714_s19, 7 }
  0x38   : > { %s453_s28 = sshll.u32 %s218_s23, 3  ;;  %s216_s13 = scalar_lea.vmem [#allocation5], %s452_s9 }
  0x39   : > { %s220_s27 = scalar_lea.vmem %s834_s0, %s453_s28  ;;  %s224_s7 = scalar_lea.vmem %s835_s1, %s453_s28 }
  0x3a   : > { %v226_v2 = vld [vmem:[%s220_s27] sm:$0xff]  ;;  %482 = vmatpush3.bf16.msra.mxu0 %v557_v6  ;;  %s363_s14 = sshll.u32 %s216_s13, 4  ;;  %s792_s23 = scalar_lea.hbm %s838_s4, %s467_s12  ;;  %s794_s14 = int_to_ptr.vmem [resolvable:$true] %s363_s14 }
  0x3b   : > { %v227_v3 = vld [vmem:[%s224_s7] sm:$0xff]  ;;  %231 = vperm.xlu0 %555, %v226_v2   ;;  %483 = vmatprep.subr.bf16.mxu0 %v664_v1  ;;  %s350_s28 = scalar_lea.sflag [#allocation4], %s214_s8  ;;  %s592_s19 = scalar_lea.vmem %s794_s14, 128 }
  0x3c   : > { %v234_v4 = vadd.s32 64, %v227_v3  ;;  %p593_p6 = scmp.ne.s32.totalorder %s794_s14, %s592_s19  ;;  %p849_p9 = scmp.ne.s32.totalorder %s842_s25, 0 }
  0x3d   : > { %s667_s30 = smov [#allocation5]  }
  0x3e   : > { %484 = vmatpush3.bf16.msra.mxu0 %v558_v7  ;;  %p594_p10 = pnand %p593_p6, %p849_p9  ;;  %s596_s29 = sshll.u32 %s667_s30, 4  ;;  %s597_s29 = int_to_ptr.vmem [resolvable:$false] %s596_s29 }
  0x3f   : > { %236 = vperm.xlu0 %555, %v234_v4   ;;  %485 = vmatprep.subr.bf16.mxu0 %v664_v1  ;;  %s598_s27 = scalar_lea.vmem %s597_s29, 256  ;;  %p599_p2 = scmp.lt.s32.totalorder %s794_s14, %s597_s29 }
  0x40   : > { %p595_p12 = pneg %p594_p10  ;;  %p600_p3 = scmp.lt.s32.totalorder %s598_s27, %s592_s19 }
  0x42   : > { %486 = vmatpush3.bf16.msra.mxu0 %v559_v8  ;;  %p601_p4 = por %p600_p3, %p599_p2 }
  0x43   : > { %487 = vmatprep.subr.bf16.mxu0 %v664_v1 }
  0x44   : > { %p602_p7 = pnand %p601_p4, %p595_p12 }
  0x46   : > { %488 = vmatpush3.bf16.msra.mxu0 %v560_v9 }
  0x47   : > { %489 = vmatprep.subr.bf16.mxu0 %v664_v1 }
  0x4a   : > { %490 = vmatpush3.bf16.msra.mxu0 %v561_v10 }
  0x4b   : > { %491 = vmatprep.subr.bf16.mxu0 %v664_v1 }
  0x4e   : > { %492 = vmatpush3.bf16.msra.mxu0 %v562_v11 }
  0x4f   : > { %493 = vmatprep.subr.bf16.mxu0 %v664_v1 }
  0x52   : > { %494 = vmatpush3.bf16.msra.mxu0 %v563_v12 }
  0xba   : > { %v232_v14 = vpop.permute.xlu0 %231 }
  0xbb   : > { %vm233_vm1 = vcmp.eq.s32.totalorder %v229_v15, %v232_v14 }
  0xbe   : > { %v237_v16 = vpop.permute.xlu0 %236 }
  0xbf   : > { %vm238_vm2 = vcmp.eq.s32.totalorder %v229_v15, %v237_v16 }
  0xc0   : > { %vm239_vm3 = vmor %vm233_vm1, %vm238_vm2 }
  0xc1   : > { %vm464_vm4 = vmpackc.low %vm239_vm3, %vm239_vm3 }
  0xc2   : > { %496 = vmatmul.mubr.msk.bf16.vlgmr.msra.gmra.mrb[0].mxu0 %vm464_vm4, %v666_v17 }
 0x195   : > { %v342_v19 = vpop.f32.mrb[0].mxu0 }
 0x196   : > { %v343_v20 = vadd.f32 %v342_v19, %v259_v18  ;;  %v497_v21 = vpop.f32.mrb[1].mxu0 }
 0x197   : > { %v345_v22 = vpop.f32.mrb[2].mxu0 }
 0x198   : > { %348 = vst [vmem:[%s216_s13] sm:$0xff] %v343_v20  ;;  %v498_v23 = vpop.f32.mrb[3].mxu0 }
 0x199   : > { %605 = shalt.err (!%p602_p7)
}
 0x19a   : > { %s606_s5 = scalar_lea.hbm %s792_s23, 128  ;;  %s610_s8 = scalar_lea.hbm %s838_s4, 256 }
 0x19b   : > { %p607_p8 = scmp.ne.s32.totalorder %s792_s23, %s606_s5  ;;  %p611_p1 = scmp.lt.u32.totalorder %s792_s23, %s838_s4 }
 0x19c   : > { %p612_p0 = scmp.lt.u32.totalorder %s610_s8, %s606_s5  ;;  %p614_p6 = scmp.lt.u32.totalorder %s606_s5, %s792_s23 }
 0x19d   : > { %p608_p11 = pnand %p607_p8, %p849_p9 }
 0x19e   : > { %p613_p5 = por %p612_p0, %p611_p1 }
 0x19f   : > { %p609_p13 = pneg %p608_p11 }
 0x1a0   : > { %p615_p10 = por %p614_p6, %p613_p5 }
 0x1a2   : > { %p616_p12 = pnand %p615_p10, %p609_p13 }
 0x1a4   : > { %619 = shalt.err (!%p616_p12)
}
 0x1a5   : > { %503 = dma.vmem_to_hbm [thread:$0]  (%p849_p9), %s794_s14, 128, %s792_s23, %s350_s28  }
 0x1a6 PF: > { %p515_p2 = scmp.ge.s32.totalorder %s658_s18, 2  ;;  %s375_s11 = sand.u32 1, %s646_s15  }
 0x1a7   : > { %p850_p3 = scmp.ne.s32.totalorder %s843_s26, 0  ;;  %s376_s12 = scalar_lea.sflag [#allocation4], %s375_s11 }
 0x1a9   : > { %p510_p4 = pnand %p515_p2, %p850_p3 }
 0x1ab   : > { %641 = dma.done.wait (!%p510_p4), %s376_s12, 128  }
 0x1ac   : > { %643 = vsyncadd (!%p510_p4), %s376_s12, 4294967168  ;;  %p15_p7 = scmp.ge.s32.totalorder %s718_s21, 4   ;;  %s851_s15 = smov %s650_s16 }
 0x1ad   : > { %s852_s16 = smov %s654_s17  ;;  %s853_s17 = smov %s729_s24 }
 0x1ae   : > { %s854_s18 = smov %s718_s21  ;;  %17 = sbr.rel (!%p15_p7) target bundleno = 4 (0x4), region = 79 }
 0x1b5   :  { %381 = vsyncpa [#allocation3], 1 }
 0x1b6   :  { %383 = vsyncpa [#allocation3 + $0x1], 1 }
 0x1b7   :  { %384 = vsyncpa [#allocation4], 1 }
 0x1b8   :  { %386 = vsyncpa [#allocation4 + $0x1], 1 }

</bundles_post_ra>
